<compile_context>
chip_gen: v6e
topology: v6e:2x2x1
jax: 0.10.0
libtpu: 0.0.40
codegen_flags: <defaults>
</compile_context>

<pallas_src>
import jax
import jax.numpy as jnp
from jax.experimental import pallas as pl
from jax.experimental.pallas import tpu as pltpu

IN_F = 1000
HID_F = 100
OUT_F = 10

HID_P = 128    # 100 padded to 128 (lane aligned hidden)
OUT_P = 128    # 10 padded to 128 (lane-dense output block)

MAX_TB = 2048          # batch tile cap
SPLIT_THRESHOLD = 1024  # batches >= this get >= 2 grid steps (v7x megacore)


def _round_up(n, m):
    return ((n + m - 1) // m) * m


def mlp_kernel(x_ref, w1_ref, b1_ref, w2_ref, b2_ref, o_ref):
    # x : [TB, 1000] f32   (cast to bf16 here; VPU work hidden under x DMA)
    # w1: [1000, 128] bf16, b1: [1, 128] f32
    # w2: [128, 128] bf16,  b2: [1, 128] f32
    # o : [TB, 128] f32    (padded lanes stay exactly zero)
    x = x_ref[...].astype(jnp.bfloat16)
    h = jnp.dot(x, w1_ref[...], preferred_element_type=jnp.float32)
    h = jnp.maximum(h + b1_ref[...], 0.0)          # bias + ReLU: free VPU filler
    y = jnp.dot(h.astype(jnp.bfloat16), w2_ref[...],
                preferred_element_type=jnp.float32) + b2_ref[...]
    o_ref[...] = y.astype(o_ref.dtype)


def prepare_params(w1_t, b1, w2_t, b2):
    """Pad params to lane-aligned shapes; store both weights in bf16.
    Padded rows/columns are zero, so padded output lanes are inert."""
    w1_p = jnp.zeros((IN_F, HID_P), jnp.float32).at[:, :HID_F].set(w1_t)
    w1_p = w1_p.astype(jnp.bfloat16)
    b1_p = jnp.zeros((1, HID_P), jnp.float32).at[0, :HID_F].set(b1)
    w2_p = jnp.zeros((HID_P, OUT_P), jnp.float32).at[:HID_F, :OUT_F].set(w2_t)
    w2_p = w2_p.astype(jnp.bfloat16)
    b2_p = jnp.zeros((1, OUT_P), jnp.float32).at[0, :OUT_F].set(b2)
    return w1_p, b1_p, w2_p, b2_p


def mlp_forward(x, params):
    """x: [B, 1000] f32 -> [B, 10] f32."""
    w1_p, b1_p, w2_p, b2_p = params
    B = x.shape[0]

    # Balanced batch tiling: enough tiles to (a) keep tiles <= MAX_TB rows and
    # (b) give the v7x megacore >= 2 grid steps for large batches, with < 8
    # padded rows per tile of waste.
    nt = max(-(-B // MAX_TB), 2 if B >= SPLIT_THRESHOLD else 1)
    if nt == 1:
        tb, bp = B, B       # full-dim block (no (8,128) constraint), no padding
        x_p = x
    else:
        tb = _round_up(-(-B // nt), 8)
        bp = nt * tb
        x_p = x if bp == B else jnp.zeros((bp, IN_F), x.dtype).at[:B].set(x)

    out_p = pl.pallas_call(
        mlp_kernel,
        out_shape=jax.ShapeDtypeStruct((bp, OUT_P), jnp.float32),
        grid=(nt,),
        in_specs=[
            pl.BlockSpec((tb, IN_F), lambda i: (i, 0)),      # x tile marches over batch
            pl.BlockSpec((IN_F, HID_P), lambda i: (0, 0)),   # weights stay VMEM-resident
            pl.BlockSpec((1, HID_P), lambda i: (0, 0)),
            pl.BlockSpec((HID_P, OUT_P), lambda i: (0, 0)),
            pl.BlockSpec((1, OUT_P), lambda i: (0, 0)),
        ],
        out_specs=pl.BlockSpec((tb, OUT_P), lambda i: (i, 0)),
        compiler_params=pltpu.CompilerParams(
            dimension_semantics=("parallel",),
        ),
    )(x_p, w1_p, b1_p, w2_p, b2_p)

    # Slice away lane padding (and batch padding, if any).
    return out_p[:B, :OUT_F]


def init_params(key):
    """Deterministic init mimicking nn.Linear default (uniform +/- 1/sqrt(fan_in)).
    PyTorch stores fc.weight as [out, in]; we keep the transposed [in, out] layout."""
    k1, k2, k3, k4 = jax.random.split(key, 4)
    bound1 = 1.0 / jnp.sqrt(IN_F)
    bound2 = 1.0 / jnp.sqrt(HID_F)
    w1_t = jax.random.uniform(k1, (IN_F, HID_F), jnp.float32, -bound1, bound1)
    b1 = jax.random.uniform(k2, (HID_F,), jnp.float32, -bound1, bound1)
    w2_t = jax.random.uniform(k3, (HID_F, OUT_F), jnp.float32, -bound2, bound2)
    b2 = jax.random.uniform(k4, (OUT_F,), jnp.float32, -bound2, bound2)
    return w1_t, b1, w2_t, b2


if __name__ == "__main__":
    key = jax.random.PRNGKey(0)
    kx, kp = jax.random.split(key)

    B = 8
    x = jax.random.normal(kx, (B, IN_F), jnp.float32)
    w1_t, b1, w2_t, b2 = init_params(kp)

    params = prepare_params(w1_t, b1, w2_t, b2)
    out = mlp_forward(x, params)
    out = jax.block_until_ready(out)

    # Reference in plain f32 JAX (faithful to the PyTorch module).
    # Tolerance absorbs bf16 operands on both dots (f32 accumulation).
    ref = jnp.maximum(x @ w1_t + b1, 0.0) @ w2_t + b2
    assert out.shape == (B, OUT_F)
    assert jnp.allclose(out, ref, atol=2e-2, rtol=2e-2), (
        f"max abs err {jnp.max(jnp.abs(out - ref))}"
    )

    print("KERNEL_OK")
</pallas_src>

<mosaic_0001>
module attributes {stable_mosaic.version = 11 : i64} {
  func.func @mlp_kernel(%arg0: i32, %arg1: memref<8x1000xf32, #tpu.memory_space<vmem>>, %arg2: memref<1000x128xbf16, #tpu.memory_space<vmem>>, %arg3: memref<1x128xf32, #tpu.memory_space<vmem>>, %arg4: memref<128x128xbf16, #tpu.memory_space<vmem>>, %arg5: memref<1x128xf32, #tpu.memory_space<vmem>>, %arg6: memref<8x128xf32, #tpu.memory_space<vmem>>) attributes {dimension_semantics = [#tpu.dimension_semantics<parallel>], iteration_bounds = array<i64: 1>, scalar_prefetch = 0 : i64, scratch_operands = 0 : i64, tpu.core_type = #tpu.core_type<tc>, window_params = [{transform_indices = @transform_0, window_bounds = array<i64: 8, 1000>}, {pipeline_mode = #tpu.pipeline_mode<synchronous>, transform_indices = @transform_1, window_bounds = array<i64: 1000, 128>}, {pipeline_mode = #tpu.pipeline_mode<synchronous>, transform_indices = @transform_2, window_bounds = array<i64: 1, 128>}, {pipeline_mode = #tpu.pipeline_mode<synchronous>, transform_indices = @transform_3, window_bounds = array<i64: 128, 128>}, {pipeline_mode = #tpu.pipeline_mode<synchronous>, transform_indices = @transform_4, window_bounds = array<i64: 1, 128>}, {transform_indices = @transform_5, window_bounds = array<i64: 8, 128>}]} {
    %c0 = arith.constant 0 : index
    %c0_0 = arith.constant 0 : index
    %0 = vector.load %arg1[%c0, %c0_0] : memref<8x1000xf32, #tpu.memory_space<vmem>>, vector<8x1000xf32>
    %1 = arith.truncf %0 : vector<8x1000xf32> to vector<8x1000xbf16>
    %c0_1 = arith.constant 0 : index
    %c0_2 = arith.constant 0 : index
    %2 = vector.load %arg2[%c0_1, %c0_2] : memref<1000x128xbf16, #tpu.memory_space<vmem>>, vector<1000x128xbf16>
    %cst = arith.constant dense<0.000000e+00> : vector<8x128xf32>
    %3 = tpu.matmul %1, %2, %cst {dimension_numbers = #tpu.dot_dimension_numbers<[1], [0], [0], [1], [0, 0, 1, 1], [], []>} : vector<8x1000xbf16>, vector<1000x128xbf16>, vector<8x128xf32> -> vector<8x128xf32>
    %c0_3 = arith.constant 0 : index
    %c0_4 = arith.constant 0 : index
    %4 = vector.load %arg3[%c0_3, %c0_4] : memref<1x128xf32, #tpu.memory_space<vmem>>, vector<1x128xf32>
    %5 = vector.broadcast %4 : vector<1x128xf32> to vector<8x128xf32>
    %6 = arith.addf %3, %5 : vector<8x128xf32>
    %cst_5 = arith.constant 0.000000e+00 : f32
    %7 = vector.broadcast %cst_5 : f32 to vector<8x128xf32>
    %8 = arith.maximumf %6, %7 : vector<8x128xf32>
    %9 = arith.truncf %8 : vector<8x128xf32> to vector<8x128xbf16>
    %c0_6 = arith.constant 0 : index
    %c0_7 = arith.constant 0 : index
    %10 = vector.load %arg4[%c0_6, %c0_7] : memref<128x128xbf16, #tpu.memory_space<vmem>>, vector<128x128xbf16>
    %cst_8 = arith.constant dense<0.000000e+00> : vector<8x128xf32>
    %11 = tpu.matmul %9, %10, %cst_8 {dimension_numbers = #tpu.dot_dimension_numbers<[1], [0], [0], [1], [0, 0, 1, 1], [], []>} : vector<8x128xbf16>, vector<128x128xbf16>, vector<8x128xf32> -> vector<8x128xf32>
    %c0_9 = arith.constant 0 : index
    %c0_10 = arith.constant 0 : index
    %12 = vector.load %arg5[%c0_9, %c0_10] : memref<1x128xf32, #tpu.memory_space<vmem>>, vector<1x128xf32>
    %13 = vector.broadcast %12 : vector<1x128xf32> to vector<8x128xf32>
    %14 = arith.addf %11, %13 : vector<8x128xf32>
    %c0_11 = arith.constant 0 : index
    %c0_12 = arith.constant 0 : index
    %15 = vector.load %arg6[%c0_11, %c0_12] : memref<8x128xf32, #tpu.memory_space<vmem>>, vector<8x128xf32>
    tpu.vector_store %arg6[%c0_11, %c0_12], %14 {strides = array<i32>} : memref<8x128xf32, #tpu.memory_space<vmem>>, vector<8x128xf32>,
    return
  }
  func.func @transform_0(%arg0: i32) -> (i32, i32) {
    %c0_i32 = arith.constant 0 : i32
    %c0_i32_0 = arith.constant 0 : i32
    return %arg0, %c0_i32 : i32, i32
  }
  func.func @transform_1(%arg0: i32) -> (i32, i32) {
    %c0_i32 = arith.constant 0 : i32
    %c0_i32_0 = arith.constant 0 : i32
    %c0_i32_1 = arith.constant 0 : i32
    return %c0_i32, %c0_i32_0 : i32, i32
  }
  func.func @transform_2(%arg0: i32) -> (i32, i32) {
    %c0_i32 = arith.constant 0 : i32
    %c0_i32_0 = arith.constant 0 : i32
    %c0_i32_1 = arith.constant 0 : i32
    return %c0_i32, %c0_i32_0 : i32, i32
  }
  func.func @transform_3(%arg0: i32) -> (i32, i32) {
    %c0_i32 = arith.constant 0 : i32
    %c0_i32_0 = arith.constant 0 : i32
    %c0_i32_1 = arith.constant 0 : i32
    return %c0_i32, %c0_i32_0 : i32, i32
  }
  func.func @transform_4(%arg0: i32) -> (i32, i32) {
    %c0_i32 = arith.constant 0 : i32
    %c0_i32_0 = arith.constant 0 : i32
    %c0_i32_1 = arith.constant 0 : i32
    return %c0_i32, %c0_i32_0 : i32, i32
  }
  func.func @transform_5(%arg0: i32) -> (i32, i32) {
    %c0_i32 = arith.constant 0 : i32
    %c0_i32_0 = arith.constant 0 : i32
    return %arg0, %c0_i32 : i32, i32
  }
}

</mosaic_0001>

<bundles_post_ra>
// kernel: tpu_custom_call.1
= control target key start
LH: loop header
LB: loop body
LE: loop exit
PB: predicated region body
PF: predicated region fallthrough
CT: control target
= control target key end

     0   :  { %10 = vsyncpa [#allocation3], 0  ;;  %s1289_s0 = inlined_call_operand.hbm [shape: f32[8,1000], index: 0, kind: input, shape index: {}]   ;;  %s1290_s1 = inlined_call_operand.hbm [shape: bf16[1000,128], index: 1, kind: input, shape index: {}]   ;;  %s1291_s2 = inlined_call_operand.vmem [shape: f32[1,128], index: 2, kind: input, shape index: {}]   ;;  %s1292_s3 = inlined_call_operand.hbm [shape: bf16[128,128], index: 3, kind: input, shape index: {}]   ;;  %s1293_s4 = inlined_call_operand.vmem [shape: f32[1,128], index: 4, kind: input, shape index: {}]   ;;  %s1294_s5 = inlined_call_operand.hbm [shape: f32[8,128], index: 5, kind: output, shape index: {}]  }
   0x1   :  { %11 = vsyncpa [#allocation6], 0 }
   0x2   :  { %12 = vsyncpa [#allocation4], 0  ;;  %s1217_s18 = smov [#allocation5]  }
   0x3   :  { %s28_s19 = sshll.u32 %s1217_s18, 4  ;;  %s29_s19 = int_to_ptr.vmem [resolvable:$true] %s28_s19 }
   0x4   :  { %s1139_s20 = scalar_lea.vmem %s29_s19, 8000  ;;  %p1144_p1 = scmp.lt.s32.totalorder %s29_s19, %s29_s19 }
   0x5   :  { %p1140_p0 = scmp.ne.s32.totalorder %s29_s19, %s1139_s20  ;;  %p1145_p2 = scmp.lt.s32.totalorder %s1139_s20, %s1139_s20 }
   0x7   :  { %p1146_p3 = por %p1145_p2, %p1144_p1 }
   0x9   :  { %p1147_p4 = pnand %p1146_p3, %p1140_p0 }
   0xb   :  { %1150 = shalt.err (!%p1147_p4)
}
   0xc   :  { %s1218_s21 = smov 64   ;;  %s1219_s22 = smov 4  }
   0xd   :  { %34 = dma.hbm_to_vmem [thread:$0]  %s1290_s1, 8000, %s29_s19, [#allocation6], %s1218_s21, %s1218_s21, %s1219_s22  }
   0xe   :  { %s1220_s25 = smov [#allocation2]   ;;  %s1221_s27 = smov [#allocation7]  }
   0xf   :  { %s19_s26 = sshll.u32 %s1220_s25, 4  ;;  %s42_s28 = sshll.u32 %s1221_s27, 4  ;;  %s20_s26 = int_to_ptr.vmem [resolvable:$true] %s19_s26  ;;  %s43_s28 = int_to_ptr.vmem [resolvable:$true] %s42_s28 }
  0x10   :  { %s1159_s29 = scalar_lea.vmem %s20_s26, 1024  ;;  %p1164_p6 = scmp.lt.s32.totalorder %s20_s26, %s20_s26 }
  0x11   :  { %p1160_p5 = scmp.ne.s32.totalorder %s20_s26, %s1159_s29  ;;  %p1165_p7 = scmp.lt.s32.totalorder %s1159_s29, %s1159_s29 }
  0x13   :  { %p1166_p8 = por %p1165_p7, %p1164_p6 }
  0x15   :  { %p1167_p9 = pnand %p1166_p8, %p1160_p5 }
  0x17   :  { %1170 = shalt.err (!%p1167_p9)
}
  0x18   :  { %22 = dma.hbm_to_vmem [thread:$0]  %s1289_s0, 1024, %s20_s26, [#allocation3]  }
  0x19   :  { %s1179_s7 = scalar_lea.vmem %s43_s28, 1024  ;;  %p1184_p11 = scmp.lt.s32.totalorder %s43_s28, %s43_s28 }
  0x1a   :  { %p1180_p10 = scmp.ne.s32.totalorder %s43_s28, %s1179_s7  ;;  %p1185_p12 = scmp.lt.s32.totalorder %s1179_s7, %s1179_s7 }
  0x1c   :  { %p1186_p13 = por %p1185_p12, %p1184_p11 }
  0x1e   :  { %p1187_p0 = pnand %p1186_p13, %p1180_p10 }
  0x20   :  { %1190 = shalt.err (!%p1187_p0)
}
  0x21   :  { %48 = dma.hbm_to_vmem [thread:$0]  %s1292_s3, 1024, %s43_s28, [#allocation6], %s1218_s21, %s1218_s21, %s1219_s22  }
  0x22   :  { %1211 = dma.done.wait [#allocation3], 1024  }
  0x23   :  { %1212 = vsyncadd [#allocation3], 4294966272 }
  0x24   :  { %1213 = dma.done.wait [#allocation6], 9024  }
  0x25   :  { %1214 = vsyncadd [#allocation6], 4294958272  ;;  %v1060_v0 = vld [vmem:[#allocation5 + $0x78] sm:$0xff]   ;;  %v1064_v4 = vld [vmem:[#allocation5 + $0x70] sm:$0xff]   ;;  %v1222_v41 = vmov 0   ;;  %vm588_vm0 = vcmask 1043456  }
  0x26   :  { %v1061_v1 = vld [vmem:[#allocation5 + $0xf8] sm:$0xff]   ;;  %956 = vmatprep.subr.bf16.mxu0 %v1060_v0  ;;  %v1065_v5 = vld [vmem:[#allocation5 + $0xf0] sm:$0xff]   ;;  %v1068_v8 = vld [vmem:[#allocation5 + $0x68] sm:$0xff]   ;;  %vm584_vm1 = vcmask 850944   ;;  %vm1224_vm2 = vmmov 0   ;;  %s1225_s11 = smov [#allocation8]  }
  0x27   :  { %v1062_v2 = vld [vmem:[#allocation5 + $0x38] sm:$0xff]   ;;  %978 = vmatprep.subr.bf16.mxu1 %v1061_v1  ;;  %v1066_v6 = vld [vmem:[#allocation5 + $0x30] sm:$0xff]   ;;  %v1069_v9 = vld [vmem:[#allocation5 + $0xe8] sm:$0xff]   ;;  %s872_s12 = sshll.u32 %s1225_s11, 4  ;;  %s873_s12 = int_to_ptr.vmem [resolvable:$true] %s872_s12 }
  0x28   :  { %v1063_v3 = vld [vmem:[#allocation5 + $0xb8] sm:$0xff]   ;;  %957 = vmatpush3.bf16.msra.mxu0 %v1062_v2  ;;  %v1067_v7 = vld [vmem:[#allocation5 + $0xb0] sm:$0xff]   ;;  %v1070_v10 = vld [vmem:[#allocation5 + $0x28] sm:$0xff]   ;;  %p1196_p2 = scmp.lt.s32.totalorder %s873_s12, %s873_s12 }
  0x29   :  { %979 = vmatpush3.bf16.msra.mxu1 %v1063_v3  ;;  %958 = vmatprep.subr.bf16.mxu0 %v1064_v4  ;;  %v1071_v11 = vld [vmem:[#allocation5 + $0xa8] sm:$0xff]   ;;  %v1072_v12 = vld [vmem:[#allocation5 + $0x60] sm:$0xff]   ;;  %v1076_v16 = vld [vmem:[#allocation5 + $0x58] sm:$0xff]  }
  0x2a   :  { %980 = vmatprep.subr.bf16.mxu1 %v1065_v5  ;;  %v1073_v13 = vld [vmem:[#allocation5 + $0xe0] sm:$0xff]   ;;  %v1077_v17 = vld [vmem:[#allocation5 + $0xd8] sm:$0xff]   ;;  %v1080_v20 = vld [vmem:[#allocation5 + $0x50] sm:$0xff]  }
  0x2b   :  { %v1074_v14 = vld [vmem:[#allocation5 + $0x20] sm:$0xff]   ;;  %v1078_v18 = vld [vmem:[#allocation5 + $0x18] sm:$0xff]   ;;  %v1081_v21 = vld [vmem:[#allocation5 + $0xd0] sm:$0xff]  }
  0x2c   :  { %959 = vmatpush3.bf16.msra.mxu0 %v1066_v6  ;;  %v1075_v15 = vld [vmem:[#allocation5 + $0xa0] sm:$0xff]   ;;  %v1079_v19 = vld [vmem:[#allocation5 + $0x98] sm:$0xff]   ;;  %v1082_v22 = vld [vmem:[#allocation5 + $0x10] sm:$0xff]  }
  0x2d   :  { %981 = vmatpush3.bf16.msra.mxu1 %v1067_v7  ;;  %960 = vmatprep.subr.bf16.mxu0 %v1068_v8  ;;  %v1083_v23 = vld [vmem:[#allocation5 + $0x90] sm:$0xff]   ;;  %v1084_v24 = vld [vmem:[#allocation5 + $0x48] sm:$0xff]   ;;  %v1088_v28 = vld [vmem:[#allocation5 + $0x40] sm:$0xff]  }
  0x2e   :  { %982 = vmatprep.subr.bf16.mxu1 %v1069_v9  ;;  %v1085_v25 = vld [vmem:[#allocation5 + $0xc8] sm:$0xff]   ;;  %v1089_v29 = vld [vmem:[#allocation5 + $0xc0] sm:$0xff]   ;;  %v64_v33 = vld [vmem:[#allocation2 + $0x18] sm:$0xff] }
  0x2f   :  { %v1086_v26 = vld [vmem:[#allocation5 + $0x8] sm:$0xff]   ;;  %v1090_v30 = vld [vmem:[#allocation5] sm:$0xff]   ;;  %v72_v36 = vpack.c.bf16 %v64_v33, %v64_v33  ;;  %v63_v38 = vld [vmem:[#allocation2 + $0x10] sm:$0xff] }
  0x30   :  { %961 = vmatpush3.bf16.msra.mxu0 %v1070_v10  ;;  %v1087_v27 = vld [vmem:[#allocation5 + $0x88] sm:$0xff]   ;;  %v1091_v31 = vld [vmem:[#allocation5 + $0x80] sm:$0xff]   ;;  %v71_v39 = vpack.c.bf16 %v63_v38, %v63_v38  ;;  %v1092_v40 = vld [vmem:[#allocation5 + $0x178] sm:$0xff]  }
  0x31   :  { %983 = vmatpush3.bf16.msra.mxu1 %v1071_v11  ;;  %962 = vmatprep.subr.bf16.mxu0 %v1072_v12  ;;  %v62_v32 = vld [vmem:[#allocation2 + $0x8] sm:$0xff]  ;;  %v61_v34 = vld [vmem:[#allocation2] sm:$0xff]  ;;  %v1093_v42 = vld [vmem:[#allocation5 + $0x138] sm:$0xff]  }
  0x32   :  { %984 = vmatprep.subr.bf16.mxu1 %v1073_v13  ;;  %v70_v35 = vpack.c.bf16 %v62_v32, %v62_v32  ;;  %v69_v37 = vpack.c.bf16 %v61_v34, %v61_v34  ;;  %664 = vmatprep.mubr.bf16.mxu1 %v72_v36  ;;  %v1094_v43 = vld [vmem:[#allocation5 + $0x1b8] sm:$0xff]   ;;  %v1095_v44 = vld [vmem:[#allocation5 + $0x170] sm:$0xff]   ;;  %v1098_v47 = vld [vmem:[#allocation5 + $0x168] sm:$0xff]  }
  0x33   :  { %v1096_v45 = vld [vmem:[#allocation5 + $0x130] sm:$0xff]   ;;  %v1099_v48 = vld [vmem:[#allocation5 + $0x128] sm:$0xff]   ;;  %v1101_v50 = vld [vmem:[#allocation5 + $0x160] sm:$0xff]  }
  0x34   :  { %963 = vmatpush3.bf16.msra.mxu0 %v1074_v14  ;;  %624 = vmatprep.mubr.bf16.mxu0 %v70_v35  ;;  %v1097_v46 = vld [vmem:[#allocation5 + $0x1b0] sm:$0xff]   ;;  %v1100_v49 = vld [vmem:[#allocation5 + $0x1a8] sm:$0xff]   ;;  %v1102_v51 = vld [vmem:[#allocation5 + $0x120] sm:$0xff]  }
  0x35   :  { %985 = vmatpush3.bf16.msra.mxu1 %v1075_v15  ;;  %964 = vmatprep.subr.bf16.mxu0 %v1076_v16  ;;  %v1103_v52 = vld [vmem:[#allocation5 + $0x1a0] sm:$0xff]   ;;  %v1104_v53 = vld [vmem:[#allocation5 + $0x158] sm:$0xff]   ;;  %v1107_v56 = vld [vmem:[#allocation5 + $0x150] sm:$0xff]  }
  0x36   :  { %986 = vmatprep.subr.bf16.mxu1 %v1077_v17  ;;  %v1105_v54 = vld [vmem:[#allocation5 + $0x118] sm:$0xff]   ;;  %v1108_v57 = vld [vmem:[#allocation5 + $0x110] sm:$0xff]   ;;  %v1110_v59 = vld [vmem:[#allocation5 + $0x148] sm:$0xff]  }
  0x37   :  { %v1106_v55 = vld [vmem:[#allocation5 + $0x198] sm:$0xff]   ;;  %v1109_v58 = vld [vmem:[#allocation5 + $0x190] sm:$0xff]   ;;  %v1111_v60 = vld [vmem:[#allocation5 + $0x108] sm:$0xff]  }
  0x38   :  { %965 = vmatpush3.bf16.msra.mxu0 %v1078_v18  ;;  %v66_v61 = vld [vmem:[#allocation2 + $0x28] sm:$0xff]  ;;  %v1113_v0 = vld [vmem:[#allocation5 + $0x140] sm:$0xff]   ;;  %v1116_v3 = vld [vmem:[#allocation5 + $0x1f0] ss:$0 sps:$4 sm:$0xff]   ;;  %v1223_v18 = vmov 0.0  }
  0x39   :  { %987 = vmatpush3.bf16.msra.mxu1 %v1079_v19  ;;  %966 = vmatprep.subr.bf16.mxu0 %v1080_v20  ;;  %v1112_v62 = vld [vmem:[#allocation5 + $0x188] sm:$0xff]   ;;  %v74_v63 = vpack.c.bf16 %v66_v61, %v66_v61  ;;  %v1114_v1 = vld [vmem:[#allocation5 + $0x100] sm:$0xff]   ;;  %v68_v5 = vld [vmem:[#allocation2 + $0x38] sm:$0xff]  ;;  %v590_v7 = vsel %vm588_vm0, %v1116_v3, 0 }
  0x3a   :  { %988 = vmatprep.subr.bf16.mxu1 %v1081_v21  ;;  %v1115_v2 = vld [vmem:[#allocation5 + $0x180] sm:$0xff]   ;;  %v76_v8 = vpack.c.bf16 %v68_v5, %v68_v5  ;;  %v1117_v9 = vld [vmem:[#allocation5 + $0x1e8] sm:$0xff]   ;;  %v1119_v11 = vld [vmem:[#allocation5 + $0x1d8] sm:$0xff]  }
  0x3b   :  { %v65_v4 = vld [vmem:[#allocation2 + $0x20] sm:$0xff]  ;;  %v1120_v12 = vld [vmem:[#allocation5 + $0x1d0] sm:$0xff]   ;;  %v1121_v13 = vld [vmem:[#allocation5 + $0x1c8] sm:$0xff]  }
  0x3c   :  { %967 = vmatpush3.bf16.msra.mxu0 %v1082_v22  ;;  %v73_v6 = vpack.c.bf16 %v65_v4, %v65_v4  ;;  %v1118_v10 = vld [vmem:[#allocation5 + $0x1e0] sm:$0xff]   ;;  %v67_v15 = vld [vmem:[#allocation2 + $0x30] sm:$0xff] }
  0x3d   :  { %989 = vmatpush3.bf16.msra.mxu1 %v1083_v23  ;;  %968 = vmatprep.subr.bf16.mxu0 %v1084_v24  ;;  %v1122_v14 = vld [vmem:[#allocation5 + $0x1c0] sm:$0xff]   ;;  %v75_v16 = vpack.c.bf16 %v67_v15, %v67_v15  ;;  %v1123_v17 = vld [vmem:[#allocation7 + $0x38] sm:$0xff]   ;;  %v1126_v21 = vld [vmem:[#allocation7 + $0x20] sm:$0xff]  }
  0x3e   :  { %990 = vmatprep.subr.bf16.mxu1 %v1085_v25  ;;  %v1124_v19 = vld [vmem:[#allocation7 + $0x30] sm:$0xff]   ;;  %v1125_v20 = vld [vmem:[#allocation7 + $0x28] sm:$0xff]   ;;  %v1127_v22 = vld [vmem:[#allocation7 + $0x18] sm:$0xff]  }
  0x3f   :  { %v1128_v23 = vld [vmem:[#allocation7 + $0x10] sm:$0xff]   ;;  %v1129_v24 = vld [vmem:[#allocation7 + $0x8] sm:$0xff]   ;;  %v1130_v25 = vld [vmem:[#allocation7] sm:$0xff]  }
  0x40   :  { %969 = vmatpush3.bf16.msra.mxu0 %v1086_v26 }
  0x41   :  { %991 = vmatpush3.bf16.msra.mxu1 %v1087_v27  ;;  %970 = vmatprep.subr.bf16.mxu0 %v1088_v28 }
  0x42   :  { %992 = vmatprep.subr.bf16.mxu1 %v1089_v29 }
  0x44   :  { %971 = vmatpush3.bf16.msra.mxu0 %v1090_v30 }
  0x45   :  { %993 = vmatpush3.bf16.msra.mxu1 %v1091_v31  ;;  %1000 = vmatprep.subr.bf16.mxu0 %v1092_v40 }
  0x46   :  { %712 = vmatprep.subr.bf16.mxu1 %v1222_v41 }
  0x47   :  { %625 = vmatmul.mubr.bf16.vlgmr.msra.gmra.mxu0 %v69_v37 }
  0x48   :  { %665 = vmatmul.mubr.bf16.vlgmr.msra.gmra.mxu1 %v71_v39  ;;  %1001 = vmatpush3.bf16.msra.mxu0 %v1093_v42  ;;  %v882_v39 = vld [vmem:[%s1291_s2] ss:$0 sm:$0xff]  ;;  %s1191_s2 = scalar_lea.vmem %s873_s12, 128 }
  0x49   :  { %713 = vmatpush1.bf16.msra.mxu1 %v1094_v43  ;;  %1002 = vmatprep.subr.bf16.mxu0 %v1095_v44  ;;  %p1192_p1 = scmp.ne.s32.totalorder %s873_s12, %s1191_s2  ;;  %p1197_p3 = scmp.lt.s32.totalorder %s1191_s2, %s1191_s2 }
  0x4a   :  { %714 = vmatprep.subr.bf16.mxu1 %v1222_v41  ;;  %704 = vmatprep.mubr.bf16.mxu0 %v74_v63 }
  0x4b   :  { %946 = vmatprep.mubr.msk.bf16.mxu1 %vm584_vm1, %v76_v8  ;;  %p1198_p4 = por %p1197_p3, %p1196_p2 }
  0x4c   :  { %1003 = vmatpush3.bf16.msra.mxu0 %v1096_v45 }
  0x4d   :  { %715 = vmatpush1.bf16.msra.mxu1 %v1097_v46  ;;  %1004 = vmatprep.subr.bf16.mxu0 %v1098_v47  ;;  %p1199_p5 = pnand %p1198_p4, %p1192_p1 }
  0x4e   :  { %716 = vmatprep.subr.bf16.mxu1 %v1222_v41 }
  0x50   :  { %1005 = vmatpush3.bf16.msra.mxu0 %v1099_v48 }
  0x51   :  { %717 = vmatpush1.bf16.msra.mxu1 %v1100_v49  ;;  %1006 = vmatprep.subr.bf16.mxu0 %v1101_v50 }
  0x52   :  { %718 = vmatprep.subr.bf16.mxu1 %v1222_v41 }
  0x54   :  { %1007 = vmatpush3.bf16.msra.mxu0 %v1102_v51 }
  0x55   :  { %719 = vmatpush1.bf16.msra.mxu1 %v1103_v52  ;;  %1008 = vmatprep.subr.bf16.mxu0 %v1104_v53  ;;  %v947_v52 = vld [vmem:[%s1293_s4] ss:$0 sm:$0xff] }
  0x56   :  { %720 = vmatprep.subr.bf16.mxu1 %v1222_v41 }
  0x58   :  { %1009 = vmatpush3.bf16.msra.mxu0 %v1105_v54 }
  0x59   :  { %721 = vmatpush1.bf16.msra.mxu1 %v1106_v55  ;;  %1010 = vmatprep.subr.bf16.mxu0 %v1107_v56 }
  0x5a   :  { %722 = vmatprep.subr.bf16.mxu1 %v1222_v41 }
  0x5c   :  { %1011 = vmatpush3.bf16.msra.mxu0 %v1108_v57 }
  0x5d   :  { %723 = vmatpush1.bf16.msra.mxu1 %v1109_v58  ;;  %1012 = vmatprep.subr.bf16.mxu0 %v1110_v59 }
  0x5e   :  { %724 = vmatprep.subr.bf16.mxu1 %v1222_v41 }
  0x60   :  { %1013 = vmatpush3.bf16.msra.mxu0 %v1111_v60 }
  0x61   :  { %725 = vmatpush1.bf16.msra.mxu1 %v1112_v62  ;;  %1014 = vmatprep.subr.bf16.mxu0 %v1113_v0 }
  0x62   :  { %726 = vmatprep.subr.bf16.mxu1 %v1222_v41 }
  0x64   :  { %1015 = vmatpush3.bf16.msra.mxu0 %v1114_v1 }
  0x65   :  { %727 = vmatpush1.bf16.msra.mxu1 %v1115_v2  ;;  %1031 = vmatprep.subr.bf16.mxu0 %v1223_v18 }
  0x66   :  { %730 = vmatprep.subr.bf16.mxu1 %v1222_v41 }
  0x67   :  { %705 = vmatmul.mubr.bf16.vlgmr.msra.gmra.mxu0 %v73_v6 }
  0x68   :  { %1032 = vmatpush3.bf16.msra.mxu0 %v1123_v17  ;;  %1047 = vmatprep.mubr.msk.bf16.mxu0 %vm1224_vm2, %v1223_v18 }
  0x69   :  { %731 = vmatpush2.bf16.msra.mxu1 %v590_v7  ;;  %1033 = vmatprep.subr.bf16.mxu0 %v1223_v18 }
  0x6a   :  { %732 = vmatprep.subr.bf16.mxu1 %v1222_v41 }
  0x6c   :  { %1034 = vmatpush3.bf16.msra.mxu0 %v1124_v19 }
  0x6d   :  { %733 = vmatpush2.bf16.msra.mxu1 %v1117_v9  ;;  %1035 = vmatprep.subr.bf16.mxu0 %v1223_v18 }
  0x6e   :  { %734 = vmatprep.subr.bf16.mxu1 %v1222_v41 }
  0x70   :  { %1036 = vmatpush3.bf16.msra.mxu0 %v1125_v20 }
  0x71   :  { %735 = vmatpush2.bf16.msra.mxu1 %v1118_v10  ;;  %1037 = vmatprep.subr.bf16.mxu0 %v1223_v18 }
  0x72   :  { %736 = vmatprep.subr.bf16.mxu1 %v1222_v41 }
  0x74   :  { %1038 = vmatpush3.bf16.msra.mxu0 %v1126_v21 }
  0x75   :  { %737 = vmatpush2.bf16.msra.mxu1 %v1119_v11  ;;  %1039 = vmatprep.subr.bf16.mxu0 %v1223_v18 }
  0x76   :  { %738 = vmatprep.subr.bf16.mxu1 %v1222_v41 }
  0x78   :  { %1040 = vmatpush3.bf16.msra.mxu0 %v1127_v22 }
  0x79   :  { %739 = vmatpush2.bf16.msra.mxu1 %v1120_v12  ;;  %1041 = vmatprep.subr.bf16.mxu0 %v1223_v18 }
  0x7a   :  { %740 = vmatprep.subr.bf16.mxu1 %v1222_v41 }
  0x7c   :  { %1042 = vmatpush3.bf16.msra.mxu0 %v1128_v23 }
  0x7d   :  { %741 = vmatpush2.bf16.msra.mxu1 %v1121_v13  ;;  %1043 = vmatprep.subr.bf16.mxu0 %v1223_v18 }
  0x7e   :  { %742 = vmatprep.subr.bf16.mxu1 %v1222_v41 }
  0x80   :  { %1044 = vmatpush3.bf16.msra.mxu0 %v1129_v24 }
  0x81   :  { %743 = vmatpush2.bf16.msra.mxu1 %v1122_v14  ;;  %1045 = vmatprep.subr.bf16.mxu0 %v1223_v18 }
  0x84   :  { %745 = vmatmul.mubr.bf16.vlgmr.msra.gmra.mxu1 %v75_v16  ;;  %1046 = vmatpush3.bf16.msra.mxu0 %v1130_v25 }
 0x107   :  { %v972_v26 = vpop.f32.mrf.mxu0 }
 0x108   :  { %v994_v27 = vpop.f32.mrf.mxu1 }
 0x109   :  { %v973_v28 = vpop.f32.mrf.mxu0 }
 0x10a   :  { %v995_v29 = vpop.f32.mrf.mxu1  ;;  %v974_v38 = vadd.f32 %v973_v28, %v972_v26 }
 0x10b   :  { %v975_v31 = vpop.f32.mrf.mxu0  ;;  %v996_v41 = vadd.f32 %v995_v29, %v994_v27 }
 0x10c   :  { %v997_v30 = vpop.f32.mrf.mxu1  ;;  %v627_v40 = vadd.f32 %v974_v38, %v882_v39 }
 0x10d   :  { %v976_v33 = vpop.f32.mrf.mxu0 }
 0x10e   :  { %v998_v32 = vpop.f32.mrf.mxu1  ;;  %v667_v43 = vadd.f32 %v996_v41, %v627_v40 }
 0x127   :  { %v1016_v34 = vpop.f32.mrf.mxu0 }
 0x129   :  { %v1017_v35 = vpop.f32.mrf.mxu0 }
 0x12a   :  { %v1018_v42 = vadd.f32 %v1017_v35, %v1016_v34 }
 0x12b   :  { %v1019_v36 = vpop.f32.mrf.mxu0 }
 0x12c   :  { %v707_v44 = vadd.f32 %v1018_v42, %v667_v43 }
 0x12d   :  { %v1020_v37 = vpop.f32.mrf.mxu0 }
 0x144   :  { %v746_v45 = vpop.f32.mrf.mxu1 }
 0x145   :  { %v747_v46 = vadd.f32 %v746_v45, %v707_v44 }
 0x146   :  { %v748_v47 = vpop.f32.mrf.mxu1 }
 0x147   :  { %v752_v48 = vmax.f32 %v747_v46, 0.0 }
 0x148   :  { %v749_v49 = vpop.f32.mrf.mxu1 }
 0x149   :  { %v753_v50 = vpack.c.bf16 %v752_v48, %v752_v48 }
 0x14a   :  { %v750_v51 = vpop.f32.mrf.mxu1 }
 0x14b   :  { %1048 = vmatmul.mubr.bf16.vlgmr.msra.gmra.mxu0 %v753_v50 }
 0x20b   :  { %v859_v53 = vpop.f32.mrf.mxu0 }
 0x20c   :  { %v860_v54 = vadd.f32 %v947_v52, %v859_v53 }
 0x20d   :  { %v1049_v55 = vpop.f32.mrf.mxu0 }
 0x20e   :  { %865 = vst [vmem:[#allocation8] sm:$0xff] %v860_v54 }
 0x20f   :  { %v862_v56 = vpop.f32.mrf.mxu0 }
 0x210   :  { %1202 = shalt.err (!%p1199_p5)
}
 0x211   :  { %875 = dma.vmem_to_hbm [thread:$0]  %s873_s12, 128, %s1294_s5, [#allocation4]   ;;  %v1050_v57 = vpop.f32.mrf.mxu0 }
 0x212   :  { %1215 = dma.done.wait [#allocation4], 128  }
 0x213   :  { %1216 = vsyncadd [#allocation4], 4294967168 }
 0x214   :  { %879 = vsyncpa [#allocation3], 1 }
 0x215   :  { %880 = vsyncpa [#allocation6], 1 }
 0x216   :  { %881 = vsyncpa [#allocation4], 1 }

</bundles_post_ra>
